<compile_context>
chip_gen: v6e
topology: v6e:2x2x1
jax: 0.10.0
libtpu: 0.0.40
codegen_flags: <defaults>
</compile_context>

<pallas_src>
import math

import jax
import jax.numpy as jnp
from jax.experimental import pallas as pl
from jax.experimental.pallas import tpu as pltpu

_LANE = 128
_SUBLANE = 8


def _rup(x: int, m: int) -> int:
    return ((x + m - 1) // m) * m


def _ffe_kernel(v_ref, bt_ref, o_ref):
    """One batch tile: x = v @ (2*pi*b).T ; out = [sin(x) | cos(x)]."""
    d_in = bt_ref.shape[0]
    e_pad = bt_ref.shape[1]
    v = v_ref[...].astype(jnp.float32)
    bt = bt_ref[...].astype(jnp.float32)
    if d_in <= 8:
        # Tiny contraction dim (PINN coords: 1-4): broadcast-FMAs on the VPU
        # instead of pushing an almost-empty K=4 matmul through the MXU.
        x_proj = v[:, 0:1] * bt[0:1, :]
        for k in range(1, d_in):
            x_proj = x_proj + v[:, k:k + 1] * bt[k:k + 1, :]
    else:
        x_proj = jnp.dot(v, bt, preferred_element_type=jnp.float32)
    # TODO(synk): if the bundle shows sin/cos expanding to VPU polynomials,
    # share one range reduction between sin and cos (sincos) for ~30% VALU cut.
    o_ref[:, :e_pad] = jnp.sin(x_proj).astype(o_ref.dtype)
    o_ref[:, e_pad:] = jnp.cos(x_proj).astype(o_ref.dtype)


def fourier_feature_encoding(v: jax.Array, b: jax.Array, *, tm: int | None = None,
                             out_dtype=None) -> jax.Array:
    """Pallas implementation of FourierFeatureEncoding.forward.

    v: [N, D_in] input points
    b: [E, D_in] random Fourier matrix (as stored by the PyTorch module)
    returns: [N, 2*E] = concat(sin(2*pi*v@b.T), cos(2*pi*v@b.T), axis=-1)

    Tip: pass out_dtype=jnp.bfloat16 when the downstream MLP is bf16 — output
    bytes dominate HBM traffic and bf16 halves the writeback.
    """
    n, d_in = v.shape
    e, d_in_b = b.shape
    assert d_in == d_in_b, "input_size mismatch between v and b"
    out_dtype = out_dtype if out_dtype is not None else v.dtype
    out_itemsize = jnp.dtype(out_dtype).itemsize
    in_itemsize = jnp.dtype(v.dtype).itemsize

    # --- lane-dense output: E padded to a multiple of 128 only if needed ----
    e_pad = _rup(e, _LANE)
    if e_pad != e:
        b = jnp.pad(b, ((0, e_pad - e), (0, 0)))

    # Fold the 2*pi scale into the (tiny, resident) weight matrix once.
    b_t = (2.0 * math.pi) * b.T.astype(jnp.float32)  # [D_in, E_pad]

    # --- generation-aware VMEM budget ---------------------------------------
    try:
        phys_vmem = int(pltpu.get_tpu_info().vmem_capacity_bytes)
    except Exception:
        phys_vmem = 64 * 1024 * 1024  # conservative fallback (v7x per-core)
    budget = min(int(phys_vmem * 0.6), 80 * 1024 * 1024)

    d_in_lanepad = _rup(d_in, _LANE)                        # v tile lane padding
    bt_bytes = 2 * _rup(d_in, _SUBLANE) * e_pad * 4         # resident weight (2 bufs)
    usable = max(budget - bt_bytes, 1 * 1024 * 1024)

    def _tile_bytes(t: int) -> int:
        out_b = t * 2 * e_pad * out_itemsize                # output tile (lane-dense)
        in_b = t * d_in_lanepad * in_itemsize               # v tile, padded to 128 lanes
        tmp_b = t * 3 * e_pad * 4                           # x_proj + sin/cos f32 temps
        return 2 * (out_b + in_b) + tmp_b                   # double-buffered in/out

    per_row = 2 * (2 * e_pad * out_itemsize + d_in_lanepad * in_itemsize) + 3 * e_pad * 4

    # --- choose the batch tile: grow toward the budget ----------------------
    if tm is None:
        tm = usable // per_row
    tm = int(tm)
    tm = min(tm, 8192)                                      # sanity cap
    tm = min(tm, _rup(n, _SUBLANE))                         # never larger than N
    # Keep >= ~8 grid steps when N is large so both v7x TensorCores get work.
    tm = min(tm, max(1024, _rup(pl.cdiv(n, 8), _SUBLANE)))
    tm = max(_SUBLANE, (tm // _SUBLANE) * _SUBLANE)
    while tm > _SUBLANE and _tile_bytes(tm) > usable:       # respects explicit tm too
        tm = max(_SUBLANE, (tm // 2 // _SUBLANE) * _SUBLANE)

    vmem_limit = int(min(phys_vmem,
                         max(_tile_bytes(tm) + bt_bytes + (4 << 20), 32 << 20)))

    grid = (pl.cdiv(n, tm),)                                # ragged last block is fine
    cost = pl.CostEstimate(
        flops=2 * n * d_in * e_pad,
        transcendentals=2 * n * e_pad,
        bytes_accessed=n * d_in * in_itemsize + d_in * e_pad * 4
        + n * 2 * e_pad * out_itemsize,
    )

    out = pl.pallas_call(
        _ffe_kernel,
        out_shape=jax.ShapeDtypeStruct((n, 2 * e_pad), out_dtype),
        grid_spec=pltpu.PrefetchScalarGridSpec(
            num_scalar_prefetch=0,
            grid=grid,
            in_specs=[
                pl.BlockSpec((tm, d_in), lambda i: (i, 0)),     # tile of v
                pl.BlockSpec((d_in, e_pad), lambda i: (0, 0)),  # full b.T, resident
            ],
            out_specs=pl.BlockSpec((tm, 2 * e_pad), lambda i: (i, 0)),
        ),
        compiler_params=pltpu.CompilerParams(
            dimension_semantics=("parallel",),   # megacore-shardable batch axis
            vmem_limit_bytes=vmem_limit,         # v5e scoped default is only 16 MiB
        ),
        cost_estimate=cost,
    )(v, b_t)

    # --- depad E (only when E % 128 != 0; costs one extra XLA pass) ---------
    if e_pad != e:
        # TODO(synk): for E % 128 != 0 consumers, prefer E a multiple of 128 or
        # take the two padded halves directly; this concat re-reads the output.
        out = jnp.concatenate([out[:, :e], out[:, e_pad:e_pad + e]], axis=-1)
    return out


def _reference(v, b):
    x_proj = 2.0 * math.pi * (v @ b.T)
    return jnp.concatenate([jnp.sin(x_proj), jnp.cos(x_proj)], axis=-1)


if __name__ == "__main__":
    key = jax.random.PRNGKey(0)

    # Case 1: PINN-style shapes (E a multiple of 128) — fast path, no padding.
    N, INPUT_SIZE, ENCODED_SIZE, SIGMA = 16, 4, 128, 1.0
    k1, k2, k3, k4 = jax.random.split(key, 4)
    v = jax.random.normal(k1, (N, INPUT_SIZE), dtype=jnp.float32)
    b = jax.random.normal(k2, (ENCODED_SIZE, INPUT_SIZE), dtype=jnp.float32) * SIGMA

    out = jax.block_until_ready(fourier_feature_encoding(v, b))
    ref = _reference(v, b)
    assert out.shape == (N, 2 * ENCODED_SIZE)
    assert jnp.allclose(out, ref, atol=1e-4, rtol=1e-4)

    # Case 2: ragged N (no wrapper padding now) and E not a multiple of 128.
    N2, E2 = 200, 192
    v2 = jax.random.normal(k3, (N2, INPUT_SIZE), dtype=jnp.float32)
    b2 = jax.random.normal(k4, (E2, INPUT_SIZE), dtype=jnp.float32) * SIGMA
    out2 = jax.block_until_ready(fourier_feature_encoding(v2, b2))
    ref2 = _reference(v2, b2)
    assert out2.shape == (N2, 2 * E2)
    assert jnp.allclose(out2, ref2, atol=1e-4, rtol=1e-4)

    print("KERNEL_OK")
</pallas_src>

<mosaic_0001>
module attributes {stable_mosaic.version = 11 : i64} {
  func.func @_ffe_kernel(%arg0: i32, %arg1: memref<16x4xf32, #tpu.memory_space<vmem>>, %arg2: memref<4x128xf32, #tpu.memory_space<vmem>>, %arg3: memref<16x256xf32, #tpu.memory_space<vmem>>) attributes {dimension_semantics = [#tpu.dimension_semantics<parallel>], iteration_bounds = array<i64: 1>, scalar_prefetch = 0 : i64, scratch_operands = 0 : i64, tpu.core_type = #tpu.core_type<tc>, window_params = [{transform_indices = @transform_0, window_bounds = array<i64: 16, 4>}, {pipeline_mode = #tpu.pipeline_mode<synchronous>, transform_indices = @transform_1, window_bounds = array<i64: 4, 128>}, {transform_indices = @transform_2, window_bounds = array<i64: 16, 256>}]} {
    %c0 = arith.constant 0 : index
    %c0_0 = arith.constant 0 : index
    %0 = vector.load %arg1[%c0, %c0_0] : memref<16x4xf32, #tpu.memory_space<vmem>>, vector<16x4xf32>
    %c0_1 = arith.constant 0 : index
    %c0_2 = arith.constant 0 : index
    %1 = vector.load %arg2[%c0_1, %c0_2] : memref<4x128xf32, #tpu.memory_space<vmem>>, vector<4x128xf32>
    %2 = vector.extract_strided_slice %0 {offsets = [0, 0], sizes = [16, 1], strides = [1, 1]} : vector<16x4xf32> to vector<16x1xf32>
    %3 = vector.extract_strided_slice %1 {offsets = [0, 0], sizes = [1, 128], strides = [1, 1]} : vector<4x128xf32> to vector<1x128xf32>
    %4 = vector.broadcast %2 : vector<16x1xf32> to vector<16x128xf32>
    %5 = vector.broadcast %3 : vector<1x128xf32> to vector<16x128xf32>
    %6 = arith.mulf %4, %5 : vector<16x128xf32>
    %7 = vector.extract_strided_slice %0 {offsets = [0, 1], sizes = [16, 1], strides = [1, 1]} : vector<16x4xf32> to vector<16x1xf32>
    %8 = vector.extract_strided_slice %1 {offsets = [1, 0], sizes = [1, 128], strides = [1, 1]} : vector<4x128xf32> to vector<1x128xf32>
    %9 = vector.broadcast %7 : vector<16x1xf32> to vector<16x128xf32>
    %10 = vector.broadcast %8 : vector<1x128xf32> to vector<16x128xf32>
    %11 = arith.mulf %9, %10 : vector<16x128xf32>
    %12 = arith.addf %6, %11 : vector<16x128xf32>
    %13 = vector.extract_strided_slice %0 {offsets = [0, 2], sizes = [16, 1], strides = [1, 1]} : vector<16x4xf32> to vector<16x1xf32>
    %14 = vector.extract_strided_slice %1 {offsets = [2, 0], sizes = [1, 128], strides = [1, 1]} : vector<4x128xf32> to vector<1x128xf32>
    %15 = vector.broadcast %13 : vector<16x1xf32> to vector<16x128xf32>
    %16 = vector.broadcast %14 : vector<1x128xf32> to vector<16x128xf32>
    %17 = arith.mulf %15, %16 : vector<16x128xf32>
    %18 = arith.addf %12, %17 : vector<16x128xf32>
    %19 = vector.extract_strided_slice %0 {offsets = [0, 3], sizes = [16, 1], strides = [1, 1]} : vector<16x4xf32> to vector<16x1xf32>
    %20 = vector.extract_strided_slice %1 {offsets = [3, 0], sizes = [1, 128], strides = [1, 1]} : vector<4x128xf32> to vector<1x128xf32>
    %21 = vector.broadcast %19 : vector<16x1xf32> to vector<16x128xf32>
    %22 = vector.broadcast %20 : vector<1x128xf32> to vector<16x128xf32>
    %23 = arith.mulf %21, %22 : vector<16x128xf32>
    %24 = arith.addf %18, %23 : vector<16x128xf32>
    %25 = math.sin %24 : vector<16x128xf32>
    %c0_3 = arith.constant 0 : index
    %c0_4 = arith.constant 0 : index
    %26 = vector.load %arg3[%c0_3, %c0_4] : memref<16x256xf32, #tpu.memory_space<vmem>>, vector<16x128xf32>
    tpu.vector_store %arg3[%c0_3, %c0_4], %25 {strides = array<i32>} : memref<16x256xf32, #tpu.memory_space<vmem>>, vector<16x128xf32>,
    %27 = math.cos %24 : vector<16x128xf32>
    %c0_5 = arith.constant 0 : index
    %c128 = arith.constant 128 : index
    %28 = vector.load %arg3[%c0_5, %c128] : memref<16x256xf32, #tpu.memory_space<vmem>>, vector<16x128xf32>
    tpu.vector_store %arg3[%c0_5, %c128], %27 {strides = array<i32>} : memref<16x256xf32, #tpu.memory_space<vmem>>, vector<16x128xf32>,
    return
  }
  func.func @transform_0(%arg0: i32) -> (i32, i32) {
    %c0_i32 = arith.constant 0 : i32
    %c0_i32_0 = arith.constant 0 : i32
    return %arg0, %c0_i32 : i32, i32
  }
  func.func @transform_1(%arg0: i32) -> (i32, i32) {
    %c0_i32 = arith.constant 0 : i32
    %c0_i32_0 = arith.constant 0 : i32
    %c0_i32_1 = arith.constant 0 : i32
    return %c0_i32, %c0_i32_0 : i32, i32
  }
  func.func @transform_2(%arg0: i32) -> (i32, i32) {
    %c0_i32 = arith.constant 0 : i32
    %c0_i32_0 = arith.constant 0 : i32
    return %arg0, %c0_i32 : i32, i32
  }
}

</mosaic_0001>

<bundles_post_ra>
// kernel: tpu_custom_call.1
= control target key start
LH: loop header
LB: loop body
LE: loop exit
PB: predicated region body
PF: predicated region fallthrough
CT: control target
= control target key end

     0   :  { %v586_v1 = vmov 1   ;;  %v587_v2 = vmov 0   ;;  %s688_s0 = inlined_call_operand.vmem [shape: f32[16,4], index: 0, kind: input, shape index: {}]   ;;  %s689_s1 = inlined_call_operand.vmem [shape: f32[4,128], index: 1, kind: input, shape index: {}]   ;;  %s690_s2 = inlined_call_operand.hbm [shape: f32[16,256], index: 2, kind: output, shape index: {}]  }
   0x1   :  { %v12_v0 = vld [vmem:[%s688_s0] sm:$0xff]  ;;  %551 = vset.pattern.permute.xlu1 %v586_v1  ;;  %550 = vset.pattern.permute.xlu0 %v587_v2 }
   0x2   :  { %7 = vsyncpa [#allocation3], 0  ;;  %32 = vperm.xlu1 %551, %v12_v0   ;;  %17 = vperm.xlu0 %550, %v12_v0   ;;  %v13_v3 = vld [vmem:[%s688_s0 + $0x8] sm:$0xff]  ;;  %v588_v4 = vmov 2   ;;  %v589_v5 = vmov 3   ;;  %v25_v6 = vlaneseq }
   0x3   :  { %v14_v12 = vld [vmem:[%s689_s1] sm:$0xf]  ;;  %v590_v59 = vmov 683565275   ;;  %v591_v63 = vmov 2475754826  }
   0x4   :  { %v26_v7 = vshrl.u32 %v25_v6, 7  ;;  %v592_v1 = vmov 2131351028   ;;  %s596_s1 = smov [#allocation2]  }
   0x5   :  { %s502_s14 = sshll.u32 %s596_s1, 4  ;;  %s503_s14 = int_to_ptr.vmem [resolvable:$true] %s502_s14 }
   0x6   :  { %36 = vperm.xlu1 %551, %v13_v3   ;;  %22 = vperm.xlu0 %550, %v13_v3   ;;  %v41_v10 = vsub.s32 1, %v26_v7  ;;  %v27_v11 = vsub.s32 0, %v26_v7  ;;  %v57_v13 = vsub.s32 2, %v26_v7  ;;  %v73_v19 = vsub.s32 3, %v26_v7  ;;  %s564_s15 = scalar_lea.vmem %s503_s14, 512  ;;  %p569_p1 = scmp.lt.s32.totalorder %s503_s14, %s503_s14 }
   0x7   :  { %p565_p0 = scmp.ne.s32.totalorder %s503_s14, %s564_s15  ;;  %p570_p2 = scmp.lt.s32.totalorder %s564_s15, %s564_s15 }
   0x8   :  { %v42_v16 = vrot.slane %v14_v12, %v41_v10  ;;  %v28_v17 = vrot.slane %v14_v12, %v27_v11  ;;  %v58_v18 = vrot.slane %v14_v12, %v57_v13  ;;  %v74_v28 = vrot.slane %v14_v12, %v73_v19 }
   0x9   :  { %v595_v12 = vmov 1326507024   ;;  %p571_p3 = por %p570_p2, %p569_p1 }
   0xa   :  { %553 = vset.pattern.permute.xlu1 %v588_v4  ;;  %552 = vset.pattern.permute.xlu0 %v588_v4 }
   0xb   :  { %52 = vperm.xlu1 %553, %v13_v3   ;;  %48 = vperm.xlu0 %552, %v12_v0   ;;  %p572_p4 = pnand %p571_p3, %p565_p0 }
   0xf   :  { %554 = vset.pattern.permute.xlu1 %v589_v5  ;;  %555 = vset.pattern.permute.xlu0 %v589_v5  ;;  %v594_v5 = vmov 920167782  }
  0x10   :  { %64 = vperm.xlu1 %554, %v12_v0   ;;  %68 = vperm.xlu0 %555, %v13_v3   ;;  %v593_v3 = vmov 2102212464  }
  0x7d   :  { %v33_v8 = vpop.permute.xlu1 %32  ;;  %v18_v9 = vpop.permute.xlu0 %17 }
  0x7e   :  { %v43_v20 = vmul.f32 %v42_v16, %v33_v8  ;;  %v29_v21 = vmul.f32 %v28_v17, %v18_v9 }
  0x80   :  { %v45_v29 = vadd.f32 %v43_v20, %v29_v21 }
  0x81   :  { %v37_v14 = vpop.permute.xlu1 %36  ;;  %v23_v15 = vpop.permute.xlu0 %22 }
  0x82   :  { %v44_v22 = vmul.f32 %v42_v16, %v37_v14  ;;  %v30_v23 = vmul.f32 %v28_v17, %v23_v15 }
  0x84   :  { %v46_v30 = vadd.f32 %v44_v22, %v30_v23 }
  0x86   :  { %v53_v24 = vpop.permute.xlu1 %52  ;;  %v49_v25 = vpop.permute.xlu0 %48 }
  0x87   :  { %v60_v26 = vmul.f32 %v58_v18, %v53_v24  ;;  %v59_v27 = vmul.f32 %v58_v18, %v49_v25 }
  0x89   :  { %v62_v33 = vadd.f32 %v60_v26, %v46_v30  ;;  %v61_v34 = vadd.f32 %v59_v27, %v45_v29 }
  0x8b   :  { %v65_v31 = vpop.permute.xlu1 %64  ;;  %v69_v32 = vpop.permute.xlu0 %68 }
  0x8c   :  { %v75_v35 = vmul.f32 %v74_v28, %v65_v31  ;;  %v76_v36 = vmul.f32 %v74_v28, %v69_v32 }
  0x8e   :  { %v623_v37 = vadd.f32 %v75_v35, %v61_v34  ;;  %v625_v38 = vadd.f32 %v76_v36, %v62_v33 }
  0x90   :  { %v79_v39 = vand.u32 2147483647, %v623_v37  ;;  %v82_v40 = vand.u32 2139095040, %v623_v37  ;;  %v186_v41 = vand.u32 2139095040, %v625_v38  ;;  %v183_v44 = vand.u32 2147483647, %v625_v38 }
  0x91   :  { %vm81_vm14 = vcmp.lt.s32.totalorder %v623_v37, 0 }
  0x92   :  { %v83_v42 = vshrl.u32 %v82_v40, 23  ;;  %v86_v43 = vand.u32 8388607, %v79_v39  ;;  %v187_v45 = vshrl.u32 %v186_v41, 23  ;;  %v635_v50 = vand.u32 8388607, %v183_v44 }
  0x93   :  { %vm80_vm15 = vcmp.le.f32.partialorder %v79_v39, 0.7853982 }
  0x94   :  { %v513_v46 = vadd.s32 4294967169, %v83_v42  ;;  %v517_v47 = vadd.s32 4294967169, %v187_v45  ;;  %v87_v49 = vor.u32 8388608, %v86_v43  ;;  %v191_v57 = vor.u32 8388608, %v635_v50 }
  0x96   :  { %v89_v48 = vadd.s32 1, %v513_v46  ;;  %v193_v51 = vadd.s32 1, %v517_v47  ;;  %v637_v56 = vshll.u32 %v87_v49, 8 }
  0x98   :  { %vm90_vm0 = vcmp.gt.s32.totalorder %v89_v48, 0  ;;  %vm194_vm1 = vcmp.gt.s32.totalorder %v193_v51, 0 }
  0x99   :  { %v91_v52 = vsel %vm90_vm0, %v89_v48, 0  ;;  %v195_v55 = vsel %vm194_vm1, %v193_v51, 0  ;;  %v231_v51 = vshll.u32 %v191_v57, 8  ;;  %vm185_vm0 = vcmp.lt.s32.totalorder %v625_v38, 0 }
  0x9a   :  { %v92_v53 = vshrl.u32 %v91_v52, 5  ;;  %v93_v54 = vand.u32 31, %v91_v52  ;;  %v640_v61 = vshrl.u32 %v195_v55, 5  ;;  %v197_v62 = vand.u32 31, %v195_v55 }
  0x9b   :  { %vm184_vm1 = vcmp.le.f32.partialorder %v183_v44, 0.7853982 }
  0x9c   :  { %v94_v58 = vsub.s32 32, %v93_v54  ;;  %v96_v60 = vshll.u32 %v590_v59, %v93_v54  ;;  %v99_v0 = vshll.u32 %v591_v63, %v93_v54  ;;  %v102_v2 = vshll.u32 %v592_v1, %v93_v54 }
  0x9d   :  { %v105_v4 = vshll.u32 %v593_v3, %v93_v54  ;;  %v108_v6 = vshll.u32 %v594_v5, %v93_v54  ;;  %vm111_vm2 = vcmp.lt.s32.totalorder %v92_v53, 1  ;;  %vm112_vm3 = vcmp.lt.s32.totalorder %v92_v53, 2 }
  0x9e   :  { %v97_v7 = vshrl.u32 %v591_v63, %v94_v58  ;;  %v100_v8 = vshrl.u32 %v592_v1, %v94_v58  ;;  %v103_v9 = vshrl.u32 %v593_v3, %v94_v58  ;;  %v95_v10 = vshrl.u32 %v590_v59, %v94_v58 }
  0x9f   :  { %v106_v11 = vshrl.u32 %v594_v5, %v94_v58  ;;  %v109_v13 = vshrl.u32 %v595_v12, %v94_v58  ;;  %v198_v17 = vsub.s32 32, %v197_v62  ;;  %vm113_vm4 = vcmp.lt.s32.totalorder %v92_v53, 3 }
  0xa0   :  { %v98_v14 = vor.u32 %v97_v7, %v96_v60  ;;  %v101_v15 = vor.u32 %v100_v8, %v99_v0  ;;  %v104_v16 = vor.u32 %v103_v9, %v102_v2  ;;  %vm114_vm5 = vcmp.lt.s32.totalorder %v92_v53, 4 }
  0xa1   :  { %v107_v18 = vor.u32 %v106_v11, %v105_v4  ;;  %v110_v19 = vor.u32 %v109_v13, %v108_v6  ;;  %v200_v27 = vshll.u32 %v590_v59, %v197_v62  ;;  %v201_v30 = vshrl.u32 %v591_v63, %v198_v17 }
  0xa2   :  { %v115_v20 = vsel %vm111_vm2, %v95_v10, %v98_v14  ;;  %v116_v21 = vsel %vm114_vm5, %v104_v16, 2102212464  ;;  %v119_v22 = vsel %vm111_vm2, %v98_v14, %v101_v15  ;;  %v123_v23 = vsel %vm111_vm2, %v101_v15, %v104_v16 }
  0xa3   :  { %v117_v24 = vsel %vm113_vm4, %v101_v15, %v116_v21  ;;  %v120_v25 = vsel %vm114_vm5, %v107_v18, 920167782  ;;  %v124_v26 = vsel %vm114_vm5, %v110_v19, 1326507024  ;;  %v203_v31 = vshll.u32 %v591_v63, %v197_v62 }
  0xa4   :  { %v121_v28 = vsel %vm113_vm4, %v104_v16, %v120_v25  ;;  %v125_v29 = vsel %vm113_vm4, %v107_v18, %v124_v26  ;;  %v118_v32 = vsel %vm112_vm3, %v115_v20, %v117_v24  ;;  %v204_v35 = vshrl.u32 %v592_v1, %v198_v17 }
  0xa5   :  { %v122_v33 = vsel %vm112_vm3, %v119_v22, %v121_v28  ;;  %v126_v34 = vsel %vm112_vm3, %v123_v23, %v125_v29  ;;  %v202_v43 = vor.u32 %v201_v30, %v200_v27  ;;  %v206_v46 = vshll.u32 %v592_v1, %v197_v62 }
  0xa6   :  { %v649_v36 = vmul.u32.u64.low %v637_v56, %v126_v34  ;;  %v650_v40 = vmul.u32.u64.high %v637_v56, %v126_v34, %v649_v36  ;;  %v653_v41 = vmul.u32.u64.low %v637_v56, %v122_v33  ;;  %v654_v42 = vmul.u32.u64.high %v637_v56, %v122_v33, %v653_v41 }
  0xa7   :  { %v205_v45 = vor.u32 %v204_v35, %v203_v31  ;;  %v207_v47 = vshrl.u32 %v593_v3, %v198_v17  ;;  %v209_v48 = vshll.u32 %v593_v3, %v197_v62  ;;  %v210_v49 = vshrl.u32 %v594_v5, %v198_v17 }
  0xa8   :  { %v213_v50 = vshrl.u32 %v595_v12, %v198_v17  ;;  %v134_v52 = vmul.u32 %v637_v56, %v118_v32  ;;  %v199_v53 = vshrl.u32 %v590_v59, %v198_v17  ;;  %v212_v55 = vshll.u32 %v594_v5, %v197_v62 }
  0xa9   :  { %v208_v54 = vor.u32 %v207_v47, %v206_v46  ;;  %vm136_vm6 = vc.u32 %v650_v40, %v653_v41  ;;  %v137_v58 = vadd.s32 1, %v654_v42  ;;  %v211_v60 = vor.u32 %v210_v49, %v209_v48 }
  0xaa   :  { %vm215_vm7 = vcmp.lt.s32.totalorder %v640_v61, 1  ;;  %v214_v63 = vor.u32 %v213_v50, %v212_v55  ;;  %vm217_vm8 = vcmp.lt.s32.totalorder %v640_v61, 3  ;;  %vm218_vm9 = vcmp.lt.s32.totalorder %v640_v61, 4 }
  0xab   :  { %v223_v0 = vsel %vm215_vm7, %v202_v43, %v205_v45  ;;  %v138_v57 = vsel %vm136_vm6, %v137_v58, %v654_v42  ;;  %v220_v1 = vsel %vm218_vm9, %v208_v54, 2102212464  ;;  %v224_v56 = vsel %vm218_vm9, %v211_v60, 920167782 }
  0xac   :  { %v227_v59 = vsel %vm215_vm7, %v205_v45, %v208_v54  ;;  %v139_v2 = vadd.s32 %v138_v57, %v134_v52  ;;  %vm216_vm10 = vcmp.lt.s32.totalorder %v640_v61, 2  ;;  %v225_v62 = vsel %vm217_vm8, %v208_v54, %v224_v56 }
  0xad   :  { %v228_v3 = vsel %vm218_vm9, %v214_v63, 1326507024  ;;  %v219_v4 = vsel %vm215_vm7, %v199_v53, %v202_v43  ;;  %v221_v5 = vsel %vm217_vm8, %v205_v45, %v220_v1  ;;  %v226_v6 = vsel %vm216_vm10, %v223_v0, %v225_v62 }
  0xae   :  { %v229_v7 = vsel %vm217_vm8, %v211_v60, %v228_v3  ;;  %v140_v8 = vadd.s32 536870912, %v139_v2  ;;  %v664_v10 = vmul.u32.u64.low %v231_v51, %v226_v6  ;;  %v665_v11 = vmul.u32.u64.high %v231_v51, %v226_v6, %v664_v10 }
  0xaf   :  { %v230_v9 = vsel %vm216_vm10, %v227_v59, %v229_v7  ;;  %v222_v15 = vsel %vm216_vm10, %v219_v4, %v221_v5  ;;  %v135_v31 = vadd.s32 %v653_v41, %v650_v40  ;;  %vm171_vm8 = vweird.f32 %v623_v37 }
  0xb0   :  { %v667_v12 = vmul.u32.u64.low %v231_v51, %v230_v9  ;;  %v668_v13 = vmul.u32.u64.high %v231_v51, %v230_v9, %v667_v12  ;;  %v141_v14 = vshrl.u32 %v140_v8, 30  ;;  %v241_v17 = vadd.s32 1, %v665_v11 }
  0xb1   :  { %v238_v61 = vmul.u32 %v231_v51, %v222_v15 }
  0xb2   :  { %v142_v16 = vshll.u32 %v141_v14, 30  ;;  %vm240_vm11 = vc.u32 %v668_v13, %v664_v10  ;;  %v239_v52 = vadd.s32 %v664_v10, %v668_v13  ;;  %v165_v63 = vsub.s32 4, %v141_v14 }
  0xb3   :  { %v242_v19 = vsel %vm240_vm11, %v241_v17, %v665_v11 }
  0xb4   :  { %v143_v18 = vsub.s32 %v139_v2, %v142_v16  ;;  %v243_v20 = vadd.s32 %v242_v19, %v238_v61  ;;  %v166_v2 = vsel %vm81_vm14, %v165_v63, %v141_v14 }
  0xb5   :  { %v168_v5 = vsel %vm80_vm15, 0, %v166_v2 }
  0xb6   :  { %v145_v21 = vsub.s32 0, %v143_v18  ;;  %v244_v22 = vadd.s32 536870912, %v243_v20  ;;  %v172_v8 = vadd.s32 3, %v168_v5  ;;  %v382_v12 = vand.u32 3, %v168_v5 }
  0xb8   :  { %v514_v23 = vmin.u32 %v145_v21, %v143_v18  ;;  %v245_v24 = vshrl.u32 %v244_v22, 30  ;;  %v173_v11 = vand.u32 3, %v172_v8  ;;  %vm384_vm3 = vcmp.eq.s32.totalorder %v382_v12, 0 }
  0xb9   :  { %vm387_vm4 = vcmp.eq.s32.totalorder %v382_v12, 2  ;;  %vm383_vm7 = vcmp.lt.s32.totalorder %v382_v12, 2 }
  0xba   :  { %v147_v25 = vclz %v514_v23  ;;  %v246_v26 = vshll.u32 %v245_v24, 30  ;;  %v269_v7 = vsub.s32 4, %v245_v24  ;;  %vm178_vm2 = vcmp.eq.s32.totalorder %v173_v11, 2 }
  0xbb   :  { %vm175_vm5 = vcmp.eq.s32.totalorder %v173_v11, 0  ;;  %vm174_vm6 = vcmp.lt.s32.totalorder %v173_v11, 2 }
  0xbc   :  { %v515_v27 = vadd.s32 4294967294, %v147_v25  ;;  %v247_v28 = vsub.s32 %v243_v20, %v246_v26  ;;  %v270_v10 = vsel %vm185_vm0, %v269_v7, %v245_v24 }
  0xbd   :  { %v272_v14 = vsel %vm184_vm1, 0, %v270_v10 }
  0xbe   :  { %vm516_vm12 = vcmp.lt.s32.totalorder %v515_v27, 0  ;;  %v249_v30 = vsub.s32 0, %v247_v28  ;;  %v276_v61 = vadd.s32 3, %v272_v14  ;;  %v485_v26 = vand.u32 3, %v272_v14 }
  0xbf   :  { %v150_v29 = vsel %vm516_vm12, 0, %v515_v27 }
  0xc0   :  { %v151_v32 = vsub.s32 32, %v150_v29  ;;  %v155_v33 = vsub.s32 4294967266, %v150_v29  ;;  %v518_v34 = vmin.u32 %v249_v30, %v247_v28  ;;  %v152_v35 = vshll.u32 %v143_v18, %v150_v29 }
  0xc1   :  { %v277_v25 = vand.u32 3, %v276_v61  ;;  %vm490_vm10 = vcmp.eq.s32.totalorder %v485_v26, 2  ;;  %vm487_vm12 = vcmp.eq.s32.totalorder %v485_v26, 0 }
  0xc2   :  { %v153_v36 = vshrl.u32 %v135_v31, %v151_v32  ;;  %v156_v42 = vadd.s32 127, %v155_v33  ;;  %v251_v43 = vclz %v518_v34 }
  0xc3   :  { %vm282_vm9 = vcmp.eq.s32.totalorder %v277_v25, 2  ;;  %vm279_vm11 = vcmp.eq.s32.totalorder %v277_v25, 0 }
  0xc4   :  { %v154_v45 = vor.u32 %v153_v36, %v152_v35  ;;  %v157_v46 = vshll.u32 %v156_v42, 23  ;;  %v519_v47 = vadd.s32 4294967294, %v251_v43 }
  0xc6   :  { %v158_v48 = vor.u32 4788187, %v157_v46  ;;  %vm520_vm13 = vcmp.lt.s32.totalorder %v519_v47, 0  ;;  %v161_v50 = vcvt.s32.f32 %v154_v45 }
  0xc7   :  { %v254_v51 = vsel %vm520_vm13, 0, %v519_v47  ;;  %vm278_vm13 = vcmp.lt.s32.totalorder %v277_v25, 2 }
  0xc8   :  { %v159_v49 = vand.u32 2147483647, %v158_v48  ;;  %v255_v53 = vsub.s32 32, %v254_v51  ;;  %v259_v54 = vsub.s32 4294967266, %v254_v51  ;;  %v256_v41 = vshll.u32 %v247_v28, %v254_v51 }
  0xca   :  { %v162_v40 = vmul.f32 %v161_v50, %v159_v49  ;;  %v257_v55 = vshrl.u32 %v239_v52, %v255_v53  ;;  %v260_v58 = vadd.s32 127, %v259_v54 }
  0xcc   :  { %v163_v60 = vxor.u32 2147483648, %v162_v40  ;;  %v258_v0 = vor.u32 %v257_v55, %v256_v41  ;;  %v261_v57 = vshll.u32 %v260_v58, 23 }
  0xce   :  { %v164_v1 = vsel %vm81_vm14, %v163_v60, %v162_v40  ;;  %v262_v59 = vor.u32 4788187, %v261_v57  ;;  %v265_v3 = vcvt.s32.f32 %v258_v0  ;;  %vm486_vm14 = vcmp.lt.s32.totalorder %v485_v26, 2 }
  0xcf   :  { %v167_v56 = vsel %vm80_vm15, %v623_v37, %v164_v1  ;;  %vm275_vm15 = vweird.f32 %v625_v38 }
  0xd0   :  { %556 = vcosq.f32 %v167_v56  ;;  %v263_v62 = vand.u32 2147483647, %v262_v59 }
  0xd1   :  { %558 = vsinq.f32 %v167_v56 }
  0xd2   :  { %v266_v4 = vmul.f32 %v265_v3, %v263_v62 }
  0xd4   :  { %v267_v6 = vxor.u32 2147483648, %v266_v4 }
  0xd6   :  { %v268_v39 = vsel %vm185_vm0, %v267_v6, %v266_v4 }
  0xd7   :  { %v271_v9 = vsel %vm184_vm1, %v625_v38, %v268_v39 }
  0xd8   :  { %560 = vcosq.f32 %v271_v9 }
  0xd9   :  { %562 = vsinq.f32 %v271_v9 }
  0xdd   :  { %v557_v13 = vpop.eup %556 }
  0xde   :  { %v559_v15 = vpop.eup %558  ;;  %v179_v16 = vxor.u32 2147483648, %v557_v13 }
  0xdf   :  { %v176_v17 = vxor.u32 2147483648, %v559_v15 }
  0xe0   :  { %v180_v18 = vsel %vm178_vm2, %v179_v16, %v559_v15  ;;  %v389_v44 = vsel %vm387_vm4, %v179_v16, %v559_v15 }
  0xe1   :  { %v177_v19 = vsel %vm175_vm5, %v557_v13, %v176_v17  ;;  %v386_v20 = vsel %vm384_vm3, %v557_v13, %v176_v17 }
  0xe2   :  { %v181_v21 = vsel %vm174_vm6, %v177_v19, %v180_v18  ;;  %v390_v22 = vsel %vm383_vm7, %v386_v20, %v389_v44 }
  0xe3   :  { %v182_v23 = vsel %vm171_vm8, nan, %v181_v21  ;;  %v391_v24 = vsel %vm171_vm8, nan, %v390_v22 }
  0xe4   :  { %287 = vst [vmem:[#allocation2] sm:$0xff] %v182_v23  ;;  %495 = vst [vmem:[#allocation2 + $0x8] sm:$0xff] %v391_v24 }
  0xe5   :  { %v561_v27 = vpop.eup %560 }
  0xe6   :  { %v563_v28 = vpop.eup %562  ;;  %v283_v29 = vxor.u32 2147483648, %v561_v27 }
  0xe7   :  { %v280_v30 = vxor.u32 2147483648, %v563_v28 }
  0xe8   :  { %v284_v31 = vsel %vm282_vm9, %v283_v29, %v563_v28  ;;  %v492_v37 = vsel %vm490_vm10, %v283_v29, %v563_v28 }
  0xe9   :  { %v281_v32 = vsel %vm279_vm11, %v561_v27, %v280_v30  ;;  %v489_v33 = vsel %vm487_vm12, %v561_v27, %v280_v30 }
  0xea   :  { %v285_v34 = vsel %vm278_vm13, %v281_v32, %v284_v31  ;;  %v493_v35 = vsel %vm486_vm14, %v489_v33, %v492_v37 }
  0xeb   :  { %v286_v36 = vsel %vm275_vm15, nan, %v285_v34  ;;  %v494_v42 = vsel %vm275_vm15, nan, %v493_v35 }
  0xec   :  { %288 = vst [vmem:[#allocation2 + $0x10] sm:$0xff] %v286_v36  ;;  %496 = vst [vmem:[#allocation2 + $0x18] sm:$0xff] %v494_v42 }
  0xed   :  { %575 = shalt.err (!%p572_p4)
}
  0xee   :  { %s597_s16 = smov 256   ;;  %s598_s17 = smov 16  }
  0xef   :  { %508 = dma.vmem_to_hbm [thread:$0]  %s503_s14, 512, %s690_s2, [#allocation3], %s597_s16, %s597_s16, %s598_s17  }
  0xf0   :  { %584 = dma.done.wait [#allocation3], 512  }
  0xf1   :  { %585 = vsyncadd [#allocation3], 4294966784 }
  0xf2   :  { %512 = vsyncpa [#allocation3], 1 }

</bundles_post_ra>
